<compile_context>
chip_gen: v7x
topology: tpu7x:2x2x1
jax: 0.10.0
libtpu: 0.0.40
codegen_flags: <defaults>
</compile_context>

<pallas_src>
import functools

import jax
import jax.numpy as jnp
from jax.experimental import pallas as pl
from jax.experimental.pallas import tpu as pltpu


def _round_up(v, m):
    return (v + m - 1) // m * m


def _pick_c_block(C, H, W, itemsize, budget_bytes):
    """Largest divisor of C whose padded (1, tc, H, W) input block fits budget."""
    tc = C
    while tc > 1 and tc * _round_up(H, 8) * _round_up(W, 128) * itemsize > budget_bytes:
        tc -= 1
        while C % tc:
            tc -= 1
    return tc


def _pick_lh_block(n_locs, c_block, fold_size, itemsize, budget_bytes,
                   max_unroll=64):
    """Largest divisor of n_locs such that the fused (lh_block*n_locs) crop
    block fits the VMEM budget and the in-kernel unroll stays bounded."""
    crop_bytes = (c_block * _round_up(fold_size, 8) *
                  _round_up(fold_size, 128) * itemsize)
    best = 1
    for cand in range(1, n_locs + 1):
        if n_locs % cand:
            continue
        if cand * n_locs > max_unroll:
            break
        if cand * n_locs * crop_bytes > budget_bytes:
            break
        best = cand
    return best


def _unfold_kernel(x_ref, o_ref, *, fold_size, fold_stride, n_locs, lh_block):
    # x_ref: (1, Cb, H, W)   image / channel block, resident across grid axis 2.
    # o_ref: (lh_block * n_locs, Cb, f, f)   all crops of lh_block row bands,
    #        one contiguous slab of the output array.
    g = pl.program_id(2)
    base = g * (lh_block * fold_stride)
    # Fully unrolled crop loops: W (lane) offsets are static, only the H
    # (sublane) start carries a dynamic grid-dependent base.
    for i in range(lh_block):
        h0 = pl.multiple_of(base + i * fold_stride, fold_stride)
        for lw in range(n_locs):
            w0 = lw * fold_stride
            crop = x_ref[0, :, pl.ds(h0, fold_size), pl.ds(w0, fold_size)]
            o_ref[i * n_locs + lw] = crop.astype(o_ref.dtype)


def unfold(x, img_size, fold_size, *, c_block=None, lh_block=None):
    """Pallas equivalent of Unfold(img_size, fold_size).forward(x).

    Args:
        x: (N, C, H, W) array with H == W == img_size.
        img_size: spatial size.
        fold_size: crop size (stride is fold_size // 2).
        c_block: optional channel tile size (must divide C).
        lh_block: optional number of crop rows fused per grid step
            (must divide n_locs).

    Returns:
        (N * n_locs**2, C, fold_size, fold_size) array; location index
        l = lh * n_locs + lw is row-major over the crop grid and varies
        fastest within each batch element (matches the PyTorch module).
    """
    # The module's n_locs formula only matches torch.nn.Unfold in this regime.
    assert fold_size % 2 == 0, "fold_size must be even"
    assert img_size % fold_size == 0, "img_size must be a multiple of fold_size"

    fold_stride = fold_size // 2
    n_locs = 2 * (img_size // fold_size) - 1
    N, C, H, W = x.shape
    assert H == img_size and W == img_size
    L = n_locs * n_locs
    itemsize = jnp.dtype(x.dtype).itemsize

    budget = 8 * 1024 * 1024
    if c_block is None:
        c_block = _pick_c_block(C, H, W, itemsize, budget_bytes=budget)
    assert C % c_block == 0, "c_block must divide C"
    n_c = C // c_block

    if lh_block is None:
        lh_block = _pick_lh_block(n_locs, c_block, fold_size, itemsize,
                                  budget_bytes=budget)
    assert n_locs % lh_block == 0, "lh_block must divide n_locs"
    n_g = n_locs // lh_block

    kernel = functools.partial(
        _unfold_kernel,
        fold_size=fold_size,
        fold_stride=fold_stride,
        n_locs=n_locs,
        lh_block=lh_block,
    )

    out_shape = jax.ShapeDtypeStruct((N * L, C, fold_size, fold_size), x.dtype)

    # VMEM budget: double-buffered input + output blocks, last two dims padded
    # to (8, 128) tiles.  Stays within v7x's 64 MiB per-TC VMEM.
    in_buf = c_block * _round_up(H, 8) * _round_up(W, 128) * itemsize
    out_buf = (lh_block * n_locs * c_block *
               _round_up(fold_size, 8) * _round_up(fold_size, 128) * itemsize)
    vmem_need = 2 * (in_buf + out_buf)
    vmem_limit = int(min(64 * 1024 * 1024, max(32 * 1024 * 1024, 2 * vmem_need)))

    # Pure data movement: read the input once, write ~4x its bytes (50% crop
    # overlap in both spatial dims).
    bytes_accessed = (N * C * H * W + N * L * C * fold_size * fold_size) * itemsize
    cost = pl.CostEstimate(flops=0, transcendentals=0,
                           bytes_accessed=bytes_accessed)

    return pl.pallas_call(
        kernel,
        out_shape=out_shape,
        grid_spec=pltpu.PrefetchScalarGridSpec(
            num_scalar_prefetch=0,
            grid=(N, n_c, n_g),
            in_specs=[
                # Channel-tiled image block of batch element n; index_map
                # ignores g, so it is fetched once and stays resident across
                # the innermost axis.
                pl.BlockSpec((1, c_block, H, W), lambda n, c, g: (n, c, 0, 0)),
            ],
            out_specs=pl.BlockSpec(
                # One block = lh_block * n_locs consecutive crops: a contiguous
                # slab of the output -> single large writeback DMA per step.
                (lh_block * n_locs, c_block, fold_size, fold_size),
                lambda n, c, g: (n * n_g + g, c, 0, 0),
            ),
        ),
        compiler_params=pltpu.CompilerParams(
            dimension_semantics=("parallel", "parallel", "parallel"),
            vmem_limit_bytes=vmem_limit,
        ),
        cost_estimate=cost,
    )(x)


def _unfold_reference(x, img_size, fold_size):
    """Pure-JAX reference reproducing the PyTorch semantics."""
    fold_stride = fold_size // 2
    n_locs = 2 * (img_size // fold_size) - 1
    N, C, _, _ = x.shape
    crops = []
    for n in range(N):
        for lh in range(n_locs):
            for lw in range(n_locs):
                h0 = lh * fold_stride
                w0 = lw * fold_stride
                crops.append(x[n, :, h0:h0 + fold_size, w0:w0 + fold_size])
    return jnp.stack(crops, axis=0)


if __name__ == "__main__":
    img_size = 16
    fold_size = 8
    N, C = 2, 4

    key = jax.random.PRNGKey(0)
    x = jax.random.normal(key, (N, C, img_size, img_size), dtype=jnp.float32)

    out = unfold(x, img_size, fold_size)
    out = jax.block_until_ready(out)

    ref = _unfold_reference(x, img_size, fold_size)
    assert out.shape == ref.shape, (out.shape, ref.shape)
    assert jnp.allclose(out, ref), "Pallas unfold mismatch vs reference"

    print("KERNEL_OK")
</pallas_src>

<mosaic_0001>
module attributes {stable_mosaic.version = 11 : i64} {
  func.func @_unfold_kernel(%arg0: i32, %arg1: i32, %arg2: i32, %arg3: memref<1x4x16x16xf32, #tpu.memory_space<vmem>>, %arg4: memref<9x4x8x8xf32, #tpu.memory_space<vmem>>) attributes {dimension_semantics = [#tpu.dimension_semantics<parallel>, #tpu.dimension_semantics<parallel>, #tpu.dimension_semantics<parallel>], iteration_bounds = array<i64: 2, 1, 1>, scalar_prefetch = 0 : i64, scratch_operands = 0 : i64, tpu.core_type = #tpu.core_type<tc>, window_params = [{transform_indices = @transform_0, window_bounds = array<i64: 1, 4, 16, 16>}, {transform_indices = @transform_1, window_bounds = array<i64: 9, 4, 8, 8>}]} {
    %c12_i32 = arith.constant 12 : i32
    %0 = arith.muli %arg2, %c12_i32 : i32
    %c0_i32 = arith.constant 0 : i32
    %1 = arith.addi %0, %c0_i32 : i32
    %2 = tpu.assume_multiple %1, 4 : i32
    %c0 = arith.constant 0 : index
    %c0_0 = arith.constant 0 : index
    %3 = arith.index_cast %2 : i32 to index
    %c0_1 = arith.constant 0 : index
    %4 = vector.load %arg3[%c0, %c0_0, %3, %c0_1] : memref<1x4x16x16xf32, #tpu.memory_space<vmem>>, vector<1x4x8x8xf32>
    %5 = vector.shape_cast %4 : vector<1x4x8x8xf32> to vector<4x8x8xf32>
    %c0_2 = arith.constant 0 : index
    %c0_3 = arith.constant 0 : index
    %c0_4 = arith.constant 0 : index
    %c0_5 = arith.constant 0 : index
    %6 = vector.load %arg4[%c0_2, %c0_3, %c0_4, %c0_5] : memref<9x4x8x8xf32, #tpu.memory_space<vmem>>, vector<1x4x8x8xf32>
    %7 = vector.shape_cast %6 : vector<1x4x8x8xf32> to vector<4x8x8xf32>
    %8 = vector.shape_cast %5 : vector<4x8x8xf32> to vector<1x4x8x8xf32>
    tpu.vector_store %arg4[%c0_2, %c0_3, %c0_4, %c0_5], %8 {strides = array<i32>} : memref<9x4x8x8xf32, #tpu.memory_space<vmem>>, vector<1x4x8x8xf32>,
    %c0_6 = arith.constant 0 : index
    %c0_7 = arith.constant 0 : index
    %9 = arith.index_cast %2 : i32 to index
    %c4 = arith.constant 4 : index
    %10 = vector.load %arg3[%c0_6, %c0_7, %9, %c4] : memref<1x4x16x16xf32, #tpu.memory_space<vmem>>, vector<1x4x8x8xf32>
    %11 = vector.shape_cast %10 : vector<1x4x8x8xf32> to vector<4x8x8xf32>
    %c1 = arith.constant 1 : index
    %c0_8 = arith.constant 0 : index
    %c0_9 = arith.constant 0 : index
    %c0_10 = arith.constant 0 : index
    %12 = vector.load %arg4[%c1, %c0_8, %c0_9, %c0_10] : memref<9x4x8x8xf32, #tpu.memory_space<vmem>>, vector<1x4x8x8xf32>
    %13 = vector.shape_cast %12 : vector<1x4x8x8xf32> to vector<4x8x8xf32>
    %14 = vector.shape_cast %11 : vector<4x8x8xf32> to vector<1x4x8x8xf32>
    tpu.vector_store %arg4[%c1, %c0_8, %c0_9, %c0_10], %14 {strides = array<i32>} : memref<9x4x8x8xf32, #tpu.memory_space<vmem>>, vector<1x4x8x8xf32>,
    %c0_11 = arith.constant 0 : index
    %c0_12 = arith.constant 0 : index
    %15 = arith.index_cast %2 : i32 to index
    %c8 = arith.constant 8 : index
    %16 = vector.load %arg3[%c0_11, %c0_12, %15, %c8] : memref<1x4x16x16xf32, #tpu.memory_space<vmem>>, vector<1x4x8x8xf32>
    %17 = vector.shape_cast %16 : vector<1x4x8x8xf32> to vector<4x8x8xf32>
    %c2 = arith.constant 2 : index
    %c0_13 = arith.constant 0 : index
    %c0_14 = arith.constant 0 : index
    %c0_15 = arith.constant 0 : index
    %18 = vector.load %arg4[%c2, %c0_13, %c0_14, %c0_15] : memref<9x4x8x8xf32, #tpu.memory_space<vmem>>, vector<1x4x8x8xf32>
    %19 = vector.shape_cast %18 : vector<1x4x8x8xf32> to vector<4x8x8xf32>
    %20 = vector.shape_cast %17 : vector<4x8x8xf32> to vector<1x4x8x8xf32>
    tpu.vector_store %arg4[%c2, %c0_13, %c0_14, %c0_15], %20 {strides = array<i32>} : memref<9x4x8x8xf32, #tpu.memory_space<vmem>>, vector<1x4x8x8xf32>,
    %c4_i32 = arith.constant 4 : i32
    %21 = arith.addi %0, %c4_i32 : i32
    %22 = tpu.assume_multiple %21, 4 : i32
    %c0_16 = arith.constant 0 : index
    %c0_17 = arith.constant 0 : index
    %23 = arith.index_cast %22 : i32 to index
    %c0_18 = arith.constant 0 : index
    %24 = vector.load %arg3[%c0_16, %c0_17, %23, %c0_18] : memref<1x4x16x16xf32, #tpu.memory_space<vmem>>, vector<1x4x8x8xf32>
    %25 = vector.shape_cast %24 : vector<1x4x8x8xf32> to vector<4x8x8xf32>
    %c3 = arith.constant 3 : index
    %c0_19 = arith.constant 0 : index
    %c0_20 = arith.constant 0 : index
    %c0_21 = arith.constant 0 : index
    %26 = vector.load %arg4[%c3, %c0_19, %c0_20, %c0_21] : memref<9x4x8x8xf32, #tpu.memory_space<vmem>>, vector<1x4x8x8xf32>
    %27 = vector.shape_cast %26 : vector<1x4x8x8xf32> to vector<4x8x8xf32>
    %28 = vector.shape_cast %25 : vector<4x8x8xf32> to vector<1x4x8x8xf32>
    tpu.vector_store %arg4[%c3, %c0_19, %c0_20, %c0_21], %28 {strides = array<i32>} : memref<9x4x8x8xf32, #tpu.memory_space<vmem>>, vector<1x4x8x8xf32>,
    %c0_22 = arith.constant 0 : index
    %c0_23 = arith.constant 0 : index
    %29 = arith.index_cast %22 : i32 to index
    %c4_24 = arith.constant 4 : index
    %30 = vector.load %arg3[%c0_22, %c0_23, %29, %c4_24] : memref<1x4x16x16xf32, #tpu.memory_space<vmem>>, vector<1x4x8x8xf32>
    %31 = vector.shape_cast %30 : vector<1x4x8x8xf32> to vector<4x8x8xf32>
    %c4_25 = arith.constant 4 : index
    %c0_26 = arith.constant 0 : index
    %c0_27 = arith.constant 0 : index
    %c0_28 = arith.constant 0 : index
    %32 = vector.load %arg4[%c4_25, %c0_26, %c0_27, %c0_28] : memref<9x4x8x8xf32, #tpu.memory_space<vmem>>, vector<1x4x8x8xf32>
    %33 = vector.shape_cast %32 : vector<1x4x8x8xf32> to vector<4x8x8xf32>
    %34 = vector.shape_cast %31 : vector<4x8x8xf32> to vector<1x4x8x8xf32>
    tpu.vector_store %arg4[%c4_25, %c0_26, %c0_27, %c0_28], %34 {strides = array<i32>} : memref<9x4x8x8xf32, #tpu.memory_space<vmem>>, vector<1x4x8x8xf32>,
    %c0_29 = arith.constant 0 : index
    %c0_30 = arith.constant 0 : index
    %35 = arith.index_cast %22 : i32 to index
    %c8_31 = arith.constant 8 : index
    %36 = vector.load %arg3[%c0_29, %c0_30, %35, %c8_31] : memref<1x4x16x16xf32, #tpu.memory_space<vmem>>, vector<1x4x8x8xf32>
    %37 = vector.shape_cast %36 : vector<1x4x8x8xf32> to vector<4x8x8xf32>
    %c5 = arith.constant 5 : index
    %c0_32 = arith.constant 0 : index
    %c0_33 = arith.constant 0 : index
    %c0_34 = arith.constant 0 : index
    %38 = vector.load %arg4[%c5, %c0_32, %c0_33, %c0_34] : memref<9x4x8x8xf32, #tpu.memory_space<vmem>>, vector<1x4x8x8xf32>
    %39 = vector.shape_cast %38 : vector<1x4x8x8xf32> to vector<4x8x8xf32>
    %40 = vector.shape_cast %37 : vector<4x8x8xf32> to vector<1x4x8x8xf32>
    tpu.vector_store %arg4[%c5, %c0_32, %c0_33, %c0_34], %40 {strides = array<i32>} : memref<9x4x8x8xf32, #tpu.memory_space<vmem>>, vector<1x4x8x8xf32>,
    %c8_i32 = arith.constant 8 : i32
    %41 = arith.addi %0, %c8_i32 : i32
    %42 = tpu.assume_multiple %41, 4 : i32
    %c0_35 = arith.constant 0 : index
    %c0_36 = arith.constant 0 : index
    %43 = arith.index_cast %42 : i32 to index
    %c0_37 = arith.constant 0 : index
    %44 = vector.load %arg3[%c0_35, %c0_36, %43, %c0_37] : memref<1x4x16x16xf32, #tpu.memory_space<vmem>>, vector<1x4x8x8xf32>
    %45 = vector.shape_cast %44 : vector<1x4x8x8xf32> to vector<4x8x8xf32>
    %c6 = arith.constant 6 : index
    %c0_38 = arith.constant 0 : index
    %c0_39 = arith.constant 0 : index
    %c0_40 = arith.constant 0 : index
    %46 = vector.load %arg4[%c6, %c0_38, %c0_39, %c0_40] : memref<9x4x8x8xf32, #tpu.memory_space<vmem>>, vector<1x4x8x8xf32>
    %47 = vector.shape_cast %46 : vector<1x4x8x8xf32> to vector<4x8x8xf32>
    %48 = vector.shape_cast %45 : vector<4x8x8xf32> to vector<1x4x8x8xf32>
    tpu.vector_store %arg4[%c6, %c0_38, %c0_39, %c0_40], %48 {strides = array<i32>} : memref<9x4x8x8xf32, #tpu.memory_space<vmem>>, vector<1x4x8x8xf32>,
    %c0_41 = arith.constant 0 : index
    %c0_42 = arith.constant 0 : index
    %49 = arith.index_cast %42 : i32 to index
    %c4_43 = arith.constant 4 : index
    %50 = vector.load %arg3[%c0_41, %c0_42, %49, %c4_43] : memref<1x4x16x16xf32, #tpu.memory_space<vmem>>, vector<1x4x8x8xf32>
    %51 = vector.shape_cast %50 : vector<1x4x8x8xf32> to vector<4x8x8xf32>
    %c7 = arith.constant 7 : index
    %c0_44 = arith.constant 0 : index
    %c0_45 = arith.constant 0 : index
    %c0_46 = arith.constant 0 : index
    %52 = vector.load %arg4[%c7, %c0_44, %c0_45, %c0_46] : memref<9x4x8x8xf32, #tpu.memory_space<vmem>>, vector<1x4x8x8xf32>
    %53 = vector.shape_cast %52 : vector<1x4x8x8xf32> to vector<4x8x8xf32>
    %54 = vector.shape_cast %51 : vector<4x8x8xf32> to vector<1x4x8x8xf32>
    tpu.vector_store %arg4[%c7, %c0_44, %c0_45, %c0_46], %54 {strides = array<i32>} : memref<9x4x8x8xf32, #tpu.memory_space<vmem>>, vector<1x4x8x8xf32>,
    %c0_47 = arith.constant 0 : index
    %c0_48 = arith.constant 0 : index
    %55 = arith.index_cast %42 : i32 to index
    %c8_49 = arith.constant 8 : index
    %56 = vector.load %arg3[%c0_47, %c0_48, %55, %c8_49] : memref<1x4x16x16xf32, #tpu.memory_space<vmem>>, vector<1x4x8x8xf32>
    %57 = vector.shape_cast %56 : vector<1x4x8x8xf32> to vector<4x8x8xf32>
    %c8_50 = arith.constant 8 : index
    %c0_51 = arith.constant 0 : index
    %c0_52 = arith.constant 0 : index
    %c0_53 = arith.constant 0 : index
    %58 = vector.load %arg4[%c8_50, %c0_51, %c0_52, %c0_53] : memref<9x4x8x8xf32, #tpu.memory_space<vmem>>, vector<1x4x8x8xf32>
    %59 = vector.shape_cast %58 : vector<1x4x8x8xf32> to vector<4x8x8xf32>
    %60 = vector.shape_cast %57 : vector<4x8x8xf32> to vector<1x4x8x8xf32>
    tpu.vector_store %arg4[%c8_50, %c0_51, %c0_52, %c0_53], %60 {strides = array<i32>} : memref<9x4x8x8xf32, #tpu.memory_space<vmem>>, vector<1x4x8x8xf32>,
    return
  }
  func.func @transform_0(%arg0: i32, %arg1: i32, %arg2: i32) -> (i32, i32, i32, i32) {
    %c0_i32 = arith.constant 0 : i32
    %c0_i32_0 = arith.constant 0 : i32
    %c0_i32_1 = arith.constant 0 : i32
    return %arg0, %arg1, %c0_i32, %c0_i32_0 : i32, i32, i32, i32
  }
  func.func @transform_1(%arg0: i32, %arg1: i32, %arg2: i32) -> (i32, i32, i32, i32) {
    %c1_i32 = arith.constant 1 : i32
    %0 = arith.muli %arg0, %c1_i32 : i32
    %1 = arith.addi %0, %arg2 : i32
    %c0_i32 = arith.constant 0 : i32
    %c0_i32_0 = arith.constant 0 : i32
    %c0_i32_1 = arith.constant 0 : i32
    return %1, %arg1, %c0_i32, %c0_i32_0 : i32, i32, i32, i32
  }
}

</mosaic_0001>

<bundles_post_ra>
// kernel: tpu_custom_call.1
= control target key start
LH: loop header
LB: loop body
LE: loop exit
PB: predicated region body
PF: predicated region fallthrough
CT: control target
= control target key end

     0   :  { %6 = vsyncpa [#allocation3], 0  ;;  %s926_s0 = inlined_call_operand.hbm [shape: f32[2,4,16,16], index: 0, kind: input, shape index: {}]   ;;  %s927_s1 = inlined_call_operand.vmem [shape: f32[18,4,8,8], index: 1, kind: output, shape index: {}]  }
   0x1   :  { %8 = vsyncpa [#allocation3 + $0x1], 0  ;;  %s703_s6 = smov 0   ;;  %s705_s7 = smov 0  }
   0x2   :  { %s707_s8 = smov 0   ;;  %s709_s9 = smov 0  }
   0x3   :  { %s711_s10 = smov 0   ;;  %s713_s11 = smov 0  }
   0x4 LB: > { %s476_s12 = sadd.s32 4294967295, %s686_s11   ;;  %s33_s13 = sadd.s32 1, %s682_s10  ;;  %s686_s11 = sphi %s713_s11, %s14_s11   ;;  %s682_s10 = sphi %s711_s10, %s935_s10   ;;  %s678_s9 = sphi %s709_s9, %s934_s9   ;;  %s674_s8 = sphi %s707_s8, %s933_s8   ;;  %s670_s7 = sphi %s705_s7, %s932_s7   ;;  %s666_s6 = sphi %s703_s6, %s931_s6  }
   0x5   : > { %p35_p0 = scmp.ge.s32.totalorder %s33_s13, 2  ;;  %s42_s14 = sadd.s32 1, %s674_s8 }
   0x6   : > { %p49_p1 = scmp.ne.s32.totalorder %s674_s8, %s670_s7  ;;  %p50_p2 = scmp.eq.s32.totalorder %s686_s11, 0 }
   0x7   : > { %s937_s13 = smov (%p35_p0, %s33_s13), 0  ;;  %p55_p4 = scmp.ne.s32.totalorder %s670_s7, %s666_s6 }
   0x8   : > { %p739_p3 = por %p50_p2, %p49_p1  ;;  %s37_s16 = ssub.s32 %s682_s10, %s937_s13 }
   0x9   : > { %p56_p5 = scmp.eq.s32.totalorder %s476_s12, 0  ;;  %p40_p6 = scmp.eq.s32.totalorder %s37_s16, 0 }
   0xa   : > { %p553_p8 = scmp.lt.s32.totalorder %s686_s11, 2  ;;  %s109_s19 = sand.u32 1, %s674_s8  }
   0xb   : > { %p746_p7 = por %p56_p5, %p55_p4  ;;  %s545_s20 = sshll.u32 %s682_s10, 10 }
   0xc   : > { %s752_s18 = scalar_select %p40_p6, %s674_s8, %s42_s14  }
   0xd   : > { %s480_s21 = sshll.u32 %s109_s19, 6  ;;  %s759_s24 = scalar_lea.hbm %s926_s0, %s545_s20 }
   0xe   : > { %s113_s25 = scalar_lea.vmem [#allocation2], %s480_s21  ;;  %p763_p9 = pnand %p553_p8, %p739_p3 }
   0xf   : > { %s123_s26 = sshll.u32 %s113_s25, 4  ;;  %s769_s28 = scalar_lea.sflag [#allocation3], %s109_s19  ;;  %s767_s26 = int_to_ptr.vmem [resolvable:$true] %s123_s26 }
  0x10   : > { %s606_s29 = scalar_lea.hbm %s759_s24, 1024  ;;  %p608_p11 = pneg %p763_p9 }
  0x11   : > { %p607_p10 = scmp.ne.s32.totalorder %s759_s24, %s606_s29  ;;  %s611_s3 = scalar_lea.hbm %s926_s0, 2048 }
  0x12   : > { %p612_p0 = scmp.lt.u32.totalorder %s759_s24, %s926_s0  ;;  %p613_p1 = scmp.lt.u32.totalorder %s611_s3, %s606_s29 }
  0x13   : > { %p609_p12 = pnand %p608_p11, %p607_p10  ;;  %p615_p3 = scmp.lt.u32.totalorder %s606_s29, %s759_s24 }
  0x14   : > { %p614_p2 = por %p613_p1, %p612_p0 }
  0x15   : > { %p610_p13 = pneg %p609_p12 }
  0x16   : > { %p616_p4 = por %p615_p3, %p614_p2 }
  0x18   : > { %p617_p5 = pnand %p616_p4, %p610_p13 }
  0x1a   : > { %620 = shalt.err (!%p617_p5)
}
  0x1b   : > { %s621_s6 = scalar_lea.vmem %s767_s26, 1024  ;;  %s688_s12 = smov [#allocation2]  }
  0x1c   : > { %p622_p6 = scmp.ne.s32.totalorder %s767_s26, %s621_s6  ;;  %s626_s14 = sshll.u32 %s688_s12, 4  ;;  %s627_s14 = int_to_ptr.vmem [resolvable:$false] %s626_s14 }
  0x1d   : > { %s628_s15 = scalar_lea.vmem %s627_s14, 2048  ;;  %p629_p12 = scmp.lt.s32.totalorder %s767_s26, %s627_s14 }
  0x1e   : > { %p624_p8 = pnand %p622_p6, %p608_p11  ;;  %p630_p0 = scmp.lt.s32.totalorder %s628_s15, %s621_s6 }
  0x20   : > { %p625_p10 = pneg %p624_p8  ;;  %p631_p1 = por %p630_p0, %p629_p12 }
  0x22   : > { %p632_p2 = pnand %p631_p1, %p625_p10 }
  0x24   : > { %635 = shalt.err (!%p632_p2)
}
  0x25   : > { %s689_s16 = smov 128   ;;  %s690_s19 = smov 8  }
  0x26   : > { %552 = dma.hbm_to_vmem [thread:$0]  (!%p763_p9), %s759_s24, 1024, %s767_s26, %s769_s28, %s689_s16, %s689_s16, %s690_s19  }
  0x27   : > { %p483_p11 = scmp.ge.s32.totalorder %s686_s11, 1  ;;  %p131_p13 = scmp.lt.s32.totalorder %s686_s11, 3 }
  0x29   : > { %p132_p3 = pnand %p483_p11, %p131_p13 }
  0x2a   : > { %s137_s20 = sand.u32 (!%p132_p3), 1, %s670_s7  }
  0x2b   : > { %135 = sbr.rel (%p132_p3) target bundleno = 213 (0xd5), region = 24  ;;  %s484_s21 = sshll.u32 (!%p132_p3), %s137_s20, 6 }
  0x2c   : > { %s138_s22 = scalar_lea.sflag (!%p132_p3), [#allocation3], %s137_s20  ;;  %s800_s23 = scalar_lea.vmem (!%p132_p3), [#allocation2], %s484_s21 }
  0x32   : > { %661 = dma.done.wait (%p746_p7), %s138_s22, 1024  }
  0x33   : > { %663 = vsyncadd (%p746_p7), %s138_s22, 4294966272  ;;  %s168_s24 = smul.u32 9, %s678_s9  ;;  %v194_v0 = vld [vmem:[%s800_s23 + $0x20] sm:$0xff]  ;;  %v195_v2 = vld [vmem:[%s800_s23 + $0x30] sm:$0xff]  ;;  %s691_s26 = smov 124   ;;  %vm187_vm0 = vcmask 64512  }
  0x34   : > { %v192_v1 = vld [vmem:[%s800_s23] sm:$0xff]  ;;  %204 = vrot.lane.b32.xlu1 %v194_v0, %s691_s26  ;;  %v193_v3 = vld [vmem:[%s800_s23 + $0x10] sm:$0xff]  ;;  %v528_v8 = vld [vmem:[%s800_s23 + $0x18] sm:$0xff]  ;;  %s692_s28 = smov 120  }
  0x35   : > { %p170_p9 = scmp.lt.s32.totalorder %s168_s24, 17  ;;  %200 = vrot.lane.b32.xlu0 %v192_v1, %s691_s26  ;;  %v504_v4 = vld [vmem:[%s800_s23 + $0x14] sm:$0xff]  ;;  %v503_v5 = vld [vmem:[%s800_s23 + $0x4] sm:$0xff] }
  0x36   : > { %v506_v6 = vld [vmem:[%s800_s23 + $0x34] sm:$0xff]  ;;  %v505_v7 = vld [vmem:[%s800_s23 + $0x24] sm:$0xff] }
  0x37   : > { %s939_s24 = smov (!%p170_p9, %s168_s24), 17  ;;  %v527_v9 = vld [vmem:[%s800_s23 + $0x8] sm:$0xff]  ;;  %v530_v10 = vld [vmem:[%s800_s23 + $0x38] sm:$0xff] }
  0x38   : > { %s546_s25 = sshll.u32 %s939_s24, 5  ;;  %v529_v11 = vld [vmem:[%s800_s23 + $0x28] sm:$0xff]  ;;  %206 = vrot.lane.b32.xlu1 %v195_v2, %s691_s26 }
  0x39   : > { %s817_s9 = scalar_lea.vmem %s927_s1, %s546_s25  ;;  %202 = vrot.lane.b32.xlu0 %v193_v3, %s691_s26 }
  0x3a   : > { %500 = vst.msk [vmem:[%s817_s9 + $0x68] sm:$0xff] %vm187_vm0, %v504_v4  ;;  %188 = vst.msk [vmem:[%s817_s9] sm:$0xff] %vm187_vm0, %v192_v1 }
  0x3b   : > { %189 = vst.msk [vmem:[%s817_s9 + $0x8] sm:$0xff] %vm187_vm0, %v193_v3  ;;  %190 = vst.msk [vmem:[%s817_s9 + $0x10] sm:$0xff] %vm187_vm0, %v194_v0 }
  0x3c   : > { %191 = vst.msk [vmem:[%s817_s9 + $0x18] sm:$0xff] %vm187_vm0, %v195_v2  ;;  %499 = vst.msk [vmem:[%s817_s9 + $0x60] sm:$0xff] %vm187_vm0, %v503_v5  ;;  %227 = vrot.lane.b32.xlu1 %v193_v3, %s692_s28 }
  0x3d   : > { %501 = vst.msk [vmem:[%s817_s9 + $0x70] sm:$0xff] %vm187_vm0, %v505_v7  ;;  %502 = vst.msk [vmem:[%s817_s9 + $0x78] sm:$0xff] %vm187_vm0, %v506_v6  ;;  %225 = vrot.lane.b32.xlu0 %v192_v1, %s692_s28 }
  0x3e   : > { %523 = vst.msk [vmem:[%s817_s9 + $0xc0] sm:$0xff] %vm187_vm0, %v527_v9  ;;  %524 = vst.msk [vmem:[%s817_s9 + $0xc8] sm:$0xff] %vm187_vm0, %v528_v8 }
  0x3f   : > { %526 = vst.msk [vmem:[%s817_s9 + $0xd8] sm:$0xff] %vm187_vm0, %v530_v10  ;;  %525 = vst.msk [vmem:[%s817_s9 + $0xd0] sm:$0xff] %vm187_vm0, %v529_v11 }
  0x40   : > { %231 = vrot.lane.b32.xlu1 %v195_v2, %s692_s28 }
  0x41   : > { %229 = vrot.lane.b32.xlu0 %v194_v0, %s692_s28 }
  0x44   : > { %263 = vrot.lane.b32.xlu1 %v504_v4, %s691_s26 }
  0x45   : > { %261 = vrot.lane.b32.xlu0 %v503_v5, %s691_s26 }
  0x48   : > { %267 = vrot.lane.b32.xlu1 %v506_v6, %s691_s26 }
  0x49   : > { %265 = vrot.lane.b32.xlu0 %v505_v7, %s691_s26 }
  0x4c   : > { %288 = vrot.lane.b32.xlu1 %v504_v4, %s692_s28 }
  0x4d   : > { %286 = vrot.lane.b32.xlu0 %v503_v5, %s692_s28 }
  0x50   : > { %292 = vrot.lane.b32.xlu1 %v506_v6, %s692_s28 }
  0x51   : > { %290 = vrot.lane.b32.xlu0 %v505_v7, %s692_s28 }
  0x54   : > { %324 = vrot.lane.b32.xlu1 %v528_v8, %s691_s26 }
  0x55   : > { %322 = vrot.lane.b32.xlu0 %v527_v9, %s691_s26 }
  0x58   : > { %328 = vrot.lane.b32.xlu1 %v530_v10, %s691_s26 }
  0x59   : > { %326 = vrot.lane.b32.xlu0 %v529_v11, %s691_s26 }
  0x5c   : > { %349 = vrot.lane.b32.xlu1 %v528_v8, %s692_s28 }
  0x5d   : > { %347 = vrot.lane.b32.xlu0 %v527_v9, %s692_s28 }
  0x60   : > { %353 = vrot.lane.b32.xlu1 %v530_v10, %s692_s28 }
  0x61   : > { %351 = vrot.lane.b32.xlu0 %v529_v11, %s692_s28 }
  0xa6   : > { %v205_v12 = vpop.permute.xlu1 %204 }
  0xa7   : > { %v201_v13 = vpop.permute.xlu0 %200  ;;  %489 = vst.msk [vmem:[%s817_s9 + $0x30] sm:$0xff] %vm187_vm0, %v205_v12 }
  0xa8   : > { %487 = vst.msk [vmem:[%s817_s9 + $0x20] sm:$0xff] %vm187_vm0, %v201_v13 }
  0xaa   : > { %v207_v14 = vpop.permute.xlu1 %206 }
  0xab   : > { %v203_v15 = vpop.permute.xlu0 %202  ;;  %490 = vst.msk [vmem:[%s817_s9 + $0x38] sm:$0xff] %vm187_vm0, %v207_v14 }
  0xac   : > { %488 = vst.msk [vmem:[%s817_s9 + $0x28] sm:$0xff] %vm187_vm0, %v203_v15 }
  0xae   : > { %v228_v16 = vpop.permute.xlu1 %227 }
  0xaf   : > { %v226_v17 = vpop.permute.xlu0 %225  ;;  %492 = vst.msk [vmem:[%s817_s9 + $0x48] sm:$0xff] %vm187_vm0, %v228_v16 }
  0xb0   : > { %491 = vst.msk [vmem:[%s817_s9 + $0x40] sm:$0xff] %vm187_vm0, %v226_v17 }
  0xb2   : > { %v232_v18 = vpop.permute.xlu1 %231 }
  0xb3   : > { %v230_v19 = vpop.permute.xlu0 %229  ;;  %494 = vst.msk [vmem:[%s817_s9 + $0x58] sm:$0xff] %vm187_vm0, %v232_v18 }
  0xb4   : > { %493 = vst.msk [vmem:[%s817_s9 + $0x50] sm:$0xff] %vm187_vm0, %v230_v19 }
  0xb6   : > { %v264_v20 = vpop.permute.xlu1 %263 }
  0xb7   : > { %v262_v21 = vpop.permute.xlu0 %261  ;;  %508 = vst.msk [vmem:[%s817_s9 + $0x88] sm:$0xff] %vm187_vm0, %v264_v20 }
  0xb8   : > { %507 = vst.msk [vmem:[%s817_s9 + $0x80] sm:$0xff] %vm187_vm0, %v262_v21 }
  0xba   : > { %v268_v22 = vpop.permute.xlu1 %267 }
  0xbb   : > { %v266_v23 = vpop.permute.xlu0 %265  ;;  %510 = vst.msk [vmem:[%s817_s9 + $0x98] sm:$0xff] %vm187_vm0, %v268_v22 }
  0xbc   : > { %509 = vst.msk [vmem:[%s817_s9 + $0x90] sm:$0xff] %vm187_vm0, %v266_v23 }
  0xbe   : > { %v289_v24 = vpop.permute.xlu1 %288 }
  0xbf   : > { %v287_v25 = vpop.permute.xlu0 %286  ;;  %516 = vst.msk [vmem:[%s817_s9 + $0xa8] sm:$0xff] %vm187_vm0, %v289_v24 }
  0xc0   : > { %515 = vst.msk [vmem:[%s817_s9 + $0xa0] sm:$0xff] %vm187_vm0, %v287_v25 }
  0xc2   : > { %v293_v26 = vpop.permute.xlu1 %292 }
  0xc3   : > { %v291_v27 = vpop.permute.xlu0 %290  ;;  %518 = vst.msk [vmem:[%s817_s9 + $0xb8] sm:$0xff] %vm187_vm0, %v293_v26 }
  0xc4   : > { %517 = vst.msk [vmem:[%s817_s9 + $0xb0] sm:$0xff] %vm187_vm0, %v291_v27 }
  0xc6   : > { %v325_v28 = vpop.permute.xlu1 %324 }
  0xc7   : > { %v323_v29 = vpop.permute.xlu0 %322  ;;  %532 = vst.msk [vmem:[%s817_s9 + $0xe8] sm:$0xff] %vm187_vm0, %v325_v28 }
  0xc8   : > { %531 = vst.msk [vmem:[%s817_s9 + $0xe0] sm:$0xff] %vm187_vm0, %v323_v29 }
  0xca   : > { %v329_v30 = vpop.permute.xlu1 %328 }
  0xcb   : > { %v327_v31 = vpop.permute.xlu0 %326  ;;  %534 = vst.msk [vmem:[%s817_s9 + $0xf8] sm:$0xff] %vm187_vm0, %v329_v30 }
  0xcc   : > { %533 = vst.msk [vmem:[%s817_s9 + $0xf0] sm:$0xff] %vm187_vm0, %v327_v31 }
  0xce   : > { %v350_v32 = vpop.permute.xlu1 %349 }
  0xcf   : > { %v348_v33 = vpop.permute.xlu0 %347  ;;  %540 = vst.msk [vmem:[%s817_s9 + $0x108] sm:$0xff] %vm187_vm0, %v350_v32 }
  0xd0   : > { %539 = vst.msk [vmem:[%s817_s9 + $0x100] sm:$0xff] %vm187_vm0, %v348_v33 }
  0xd2   : > { %v354_v34 = vpop.permute.xlu1 %353 }
  0xd3   : > { %v352_v35 = vpop.permute.xlu0 %351  ;;  %542 = vst.msk [vmem:[%s817_s9 + $0x118] sm:$0xff] %vm187_vm0, %v354_v34 }
  0xd4   : > { %541 = vst.msk [vmem:[%s817_s9 + $0x110] sm:$0xff] %vm187_vm0, %v352_v35 }
  0xd5 PF: > { %s14_s11 = sadd.s32 1, %s686_s11   ;;  %s931_s6 = smov %s670_s7 }
  0xd6   : > { %p11_p7 = scmp.ge.s32.totalorder %s14_s11, 4   ;;  %s932_s7 = smov %s674_s8 }
  0xd7   : > { %s933_s8 = smov %s752_s18  ;;  %s934_s9 = smov %s682_s10 }
  0xd8   : > { %s935_s10 = smov %s937_s13  ;;  %13 = sbr.rel (!%p11_p7) target bundleno = 4 (0x4), region = 75 }
  0xdf   :  { %400 = vsyncpa [#allocation3], 1 }
  0xe0   :  { %402 = vsyncpa [#allocation3 + $0x1], 1 }

</bundles_post_ra>
